<compile_context>
chip_gen: v7x
topology: tpu7x:2x2x1
jax: 0.10.0
libtpu: 0.0.40
codegen_flags: <defaults>
</compile_context>

<pallas_src>
import numpy as np
import jax
import jax.numpy as jnp
from jax import lax
from jax.experimental import pallas as pl
from jax.experimental.pallas import tpu as pltpu


_UNROLL = 8  # rows gathered per fori_loop iteration (amortizes scalar loop overhead)


def _mf_kernel(uid_ref, iid_ref, ue_ref, ie_ref, bias_ref, o_ref, prod_ref):
    # uid_ref, iid_ref : SMEM (B_pad,) int32   scalar-prefetched ids
    # ue_ref           : VMEM (num_users, M)   full user embedding table (resident)
    # ie_ref           : VMEM (num_items, M)   full item embedding table (resident)
    # bias_ref         : VMEM (1, TB)          pre-gathered user_bias+item_bias+offset
    # o_ref            : VMEM (1, TB)          output scores (lane-dense)
    # prod_ref         : VMEM (TB, M) scratch  gathered elementwise products
    tb = o_ref.shape[1]
    base = pl.program_id(0) * tb

    def gather_block(step, carry):
        # _UNROLL independent row-gather chains per iteration: scalar id reads from
        # SMEM, dynamic-row loads from the resident tables, one (1, M) store each.
        row0 = pl.multiple_of(step * _UNROLL, _UNROLL)
        for j in range(_UNROLL):
            t = row0 + j
            u = uid_ref[base + t]                   # scalar read from SMEM
            i = iid_ref[base + t]
            u_row = ue_ref[pl.ds(u, 1), :]          # (1, M) dynamic row from VMEM
            i_row = ie_ref[pl.ds(i, 1), :]          # (1, M)
            prod_ref[pl.ds(t, 1), :] = u_row * i_row
        return carry

    lax.fori_loop(0, tb // _UNROLL, gather_block, 0)

    # Vectorized reduction over the feature axis + bias add, stored lane-dense.
    score = jnp.sum(prod_ref[...], axis=-1)         # (TB,)
    o_ref[...] = score.reshape(1, tb) + bias_ref[...]


def mf_advanced_forward(user, item, user_emb, item_emb, user_bias, item_bias,
                        offset, *, tb=256):
    """Pallas forward pass. user/item: int [B]; tables: [N, M] float32."""
    B = user.shape[0]
    num_users, M = user_emb.shape
    num_items, _ = item_emb.shape

    # Batch tile size: multiple of 128 (lane-dense output), shrunk for tiny batches.
    tb = ((int(tb) + 127) // 128) * 128
    tb = max(128, min(tb, max(128, pl.next_power_of_2(B))))
    assert tb % _UNROLL == 0
    n_blocks = pl.cdiv(B, tb)
    b_pad = n_blocks * tb
    pad = b_pad - B

    # Clamp ids so a bad index can never read outside the tables; pad to B_pad.
    uid = jnp.clip(user.astype(jnp.int32), 0, num_users - 1)
    iid = jnp.clip(item.astype(jnp.int32), 0, num_items - 1)
    uid = jnp.pad(uid, (0, pad))
    iid = jnp.pad(iid, (0, pad))

    # Pre-gather the tiny per-element bias terms (removes 3 x 4-byte DMAs per
    # element from the kernel); offset folded into the same lane-dense tile.
    bias = (user_bias[uid] + item_bias[iid] + offset[0]).astype(jnp.float32)
    bias = bias.reshape(n_blocks, tb)

    ue = user_emb.astype(jnp.float32)
    ie = item_emb.astype(jnp.float32)

    # Raise the scoped VMEM limit only if the resident tables need it.
    # TODO(synk): very large tables (> ~30 MiB combined on v7x) would need a
    # per-row DMA-gather variant instead of VMEM-resident tables.
    table_bytes = 4 * M * (num_users + num_items)
    need = 2 * table_bytes + 4 * tb * max(M, 128) + 4 * 4 * tb * 2
    vmem_limit = None
    if need > 16 * 1024 * 1024:                     # v5e default scoped limit
        vmem_limit = min(64 * 1024 * 1024, int(need * 1.25))

    grid_spec = pltpu.PrefetchScalarGridSpec(
        num_scalar_prefetch=2,          # user ids, item ids -> SMEM before the grid
        grid=(n_blocks,),               # one step per TB-wide batch tile
        in_specs=[
            # Whole tables as single VMEM-resident blocks (constant block index).
            pl.BlockSpec((num_users, M), lambda b, u_sm, i_sm: (0, 0)),
            pl.BlockSpec((num_items, M), lambda b, u_sm, i_sm: (0, 0)),
            # Lane-dense bias tile per grid step.
            pl.BlockSpec((1, tb), lambda b, u_sm, i_sm: (b, 0)),
        ],
        out_specs=pl.BlockSpec((1, tb), lambda b, u_sm, i_sm: (b, 0)),
        scratch_shapes=[pltpu.VMEM((tb, M), jnp.float32)],
    )

    out = pl.pallas_call(
        _mf_kernel,
        grid_spec=grid_spec,
        out_shape=jax.ShapeDtypeStruct((n_blocks, tb), jnp.float32),
        compiler_params=pltpu.CompilerParams(
            dimension_semantics=("parallel",),   # batch tiles independent (v7x 2 TCs)
            vmem_limit_bytes=vmem_limit,
        ),
    )(uid, iid, ue, ie, bias)
    return out.reshape(b_pad)[:B]


def mf_advanced_ref(user, item, user_emb, item_emb, user_bias, item_bias, offset):
    """Pure-JAX reference matching the PyTorch forward."""
    ue = user_emb[user]                                  # (B, M)
    ie = item_emb[item]                                  # (B, M)
    score = (ue * ie).sum(axis=1)                        # (B,)
    return score + user_bias[user] + item_bias[item] + offset[0]


if __name__ == "__main__":
    # Small, deterministic synthetic config (module __init__ gives the shapes).
    num_users, num_items, M = 10, 12, 32
    B = 8

    key = jax.random.PRNGKey(0)
    k_ue, k_ie, k_ub, k_ib, k_off, k_u, k_i = jax.random.split(key, 7)

    # nn.Embedding default init is N(0, 1); biases/offset are zeros in __init__,
    # but we use small random values here so the bias path is actually exercised.
    user_emb = jax.random.normal(k_ue, (num_users, M), dtype=jnp.float32)
    item_emb = jax.random.normal(k_ie, (num_items, M), dtype=jnp.float32)
    user_bias = 0.1 * jax.random.normal(k_ub, (num_users,), dtype=jnp.float32)
    item_bias = 0.1 * jax.random.normal(k_ib, (num_items,), dtype=jnp.float32)
    offset = 0.1 * jax.random.normal(k_off, (1,), dtype=jnp.float32)

    user = jax.random.randint(k_u, (B,), 0, num_users, dtype=jnp.int32)
    item = jax.random.randint(k_i, (B,), 0, num_items, dtype=jnp.int32)

    out = mf_advanced_forward(user, item, user_emb, item_emb,
                              user_bias, item_bias, offset)
    out = jax.block_until_ready(out)

    ref = mf_advanced_ref(user, item, user_emb, item_emb,
                          user_bias, item_bias, offset)
    np.testing.assert_allclose(np.asarray(out), np.asarray(ref),
                               rtol=1e-5, atol=1e-5)
    print("KERNEL_OK")
</pallas_src>

<mosaic_0001>
module attributes {stable_mosaic.version = 11 : i64} {
  func.func @_mf_kernel(%arg0: i32, %arg1: memref<128xi32, #tpu.memory_space<smem>>, %arg2: memref<128xi32, #tpu.memory_space<smem>>, %arg3: memref<10x32xf32, #tpu.memory_space<vmem>>, %arg4: memref<12x32xf32, #tpu.memory_space<vmem>>, %arg5: memref<1x128xf32, #tpu.memory_space<vmem>>, %arg6: memref<1x128xf32, #tpu.memory_space<vmem>>, %arg7: memref<128x32xf32, #tpu.memory_space<vmem>>) attributes {dimension_semantics = [#tpu.dimension_semantics<parallel>], iteration_bounds = array<i64: 1>, scalar_prefetch = 2 : i64, scratch_operands = 1 : i64, tpu.core_type = #tpu.core_type<tc>, window_params = [{pipeline_mode = #tpu.pipeline_mode<synchronous>, transform_indices = @transform_0, window_bounds = array<i64: 10, 32>}, {pipeline_mode = #tpu.pipeline_mode<synchronous>, transform_indices = @transform_1, window_bounds = array<i64: 12, 32>}, {transform_indices = @transform_2, window_bounds = array<i64: 1, 128>}, {transform_indices = @transform_3, window_bounds = array<i64: 1, 128>}]} {
    %c128_i32 = arith.constant 128 : i32
    %0 = arith.muli %arg0, %c128_i32 : i32
    %c0_i32 = arith.constant 0 : i32
    %c16_i32 = arith.constant 16 : i32
    %1 = arith.addi %c0_i32, %c16_i32 : i32
    %c1_i32 = arith.constant 1 : i32
    scf.for %arg8 = %c0_i32 to %1 step %c1_i32  : i32 {
      %c8_i32 = arith.constant 8 : i32
      %8 = arith.muli %arg8, %c8_i32 : i32
      %9 = tpu.assume_multiple %8, 8 : i32
      %c0_i32_6 = arith.constant 0 : i32
      %10 = arith.addi %9, %c0_i32_6 : i32
      %11 = arith.addi %0, %10 : i32
      %12 = arith.index_cast %11 : i32 to index
      %13 = memref.load %arg1[%12] : memref<128xi32, #tpu.memory_space<smem>>
      %14 = arith.addi %0, %10 : i32
      %15 = arith.index_cast %14 : i32 to index
      %16 = memref.load %arg2[%15] : memref<128xi32, #tpu.memory_space<smem>>
      %17 = arith.index_cast %13 : i32 to index
      %c0_7 = arith.constant 0 : index
      %18 = vector.load %arg3[%17, %c0_7] : memref<10x32xf32, #tpu.memory_space<vmem>>, vector<1x32xf32>
      %19 = arith.index_cast %16 : i32 to index
      %c0_8 = arith.constant 0 : index
      %20 = vector.load %arg4[%19, %c0_8] : memref<12x32xf32, #tpu.memory_space<vmem>>, vector<1x32xf32>
      %21 = arith.mulf %18, %20 : vector<1x32xf32>
      %22 = arith.index_cast %10 : i32 to index
      %c0_9 = arith.constant 0 : index
      %23 = vector.load %arg7[%22, %c0_9] : memref<128x32xf32, #tpu.memory_space<vmem>>, vector<1x32xf32>
      tpu.vector_store %arg7[%22, %c0_9], %21 {strides = array<i32>} : memref<128x32xf32, #tpu.memory_space<vmem>>, vector<1x32xf32>,
      %c1_i32_10 = arith.constant 1 : i32
      %24 = arith.addi %9, %c1_i32_10 : i32
      %25 = arith.addi %0, %24 : i32
      %26 = arith.index_cast %25 : i32 to index
      %27 = memref.load %arg1[%26] : memref<128xi32, #tpu.memory_space<smem>>
      %28 = arith.addi %0, %24 : i32
      %29 = arith.index_cast %28 : i32 to index
      %30 = memref.load %arg2[%29] : memref<128xi32, #tpu.memory_space<smem>>
      %31 = arith.index_cast %27 : i32 to index
      %c0_11 = arith.constant 0 : index
      %32 = vector.load %arg3[%31, %c0_11] : memref<10x32xf32, #tpu.memory_space<vmem>>, vector<1x32xf32>
      %33 = arith.index_cast %30 : i32 to index
      %c0_12 = arith.constant 0 : index
      %34 = vector.load %arg4[%33, %c0_12] : memref<12x32xf32, #tpu.memory_space<vmem>>, vector<1x32xf32>
      %35 = arith.mulf %32, %34 : vector<1x32xf32>
      %36 = arith.index_cast %24 : i32 to index
      %c0_13 = arith.constant 0 : index
      %37 = vector.load %arg7[%36, %c0_13] : memref<128x32xf32, #tpu.memory_space<vmem>>, vector<1x32xf32>
      tpu.vector_store %arg7[%36, %c0_13], %35 {strides = array<i32>} : memref<128x32xf32, #tpu.memory_space<vmem>>, vector<1x32xf32>,
      %c2_i32 = arith.constant 2 : i32
      %38 = arith.addi %9, %c2_i32 : i32
      %39 = arith.addi %0, %38 : i32
      %40 = arith.index_cast %39 : i32 to index
      %41 = memref.load %arg1[%40] : memref<128xi32, #tpu.memory_space<smem>>
      %42 = arith.addi %0, %38 : i32
      %43 = arith.index_cast %42 : i32 to index
      %44 = memref.load %arg2[%43] : memref<128xi32, #tpu.memory_space<smem>>
      %45 = arith.index_cast %41 : i32 to index
      %c0_14 = arith.constant 0 : index
      %46 = vector.load %arg3[%45, %c0_14] : memref<10x32xf32, #tpu.memory_space<vmem>>, vector<1x32xf32>
      %47 = arith.index_cast %44 : i32 to index
      %c0_15 = arith.constant 0 : index
      %48 = vector.load %arg4[%47, %c0_15] : memref<12x32xf32, #tpu.memory_space<vmem>>, vector<1x32xf32>
      %49 = arith.mulf %46, %48 : vector<1x32xf32>
      %50 = arith.index_cast %38 : i32 to index
      %c0_16 = arith.constant 0 : index
      %51 = vector.load %arg7[%50, %c0_16] : memref<128x32xf32, #tpu.memory_space<vmem>>, vector<1x32xf32>
      tpu.vector_store %arg7[%50, %c0_16], %49 {strides = array<i32>} : memref<128x32xf32, #tpu.memory_space<vmem>>, vector<1x32xf32>,
      %c3_i32 = arith.constant 3 : i32
      %52 = arith.addi %9, %c3_i32 : i32
      %53 = arith.addi %0, %52 : i32
      %54 = arith.index_cast %53 : i32 to index
      %55 = memref.load %arg1[%54] : memref<128xi32, #tpu.memory_space<smem>>
      %56 = arith.addi %0, %52 : i32
      %57 = arith.index_cast %56 : i32 to index
      %58 = memref.load %arg2[%57] : memref<128xi32, #tpu.memory_space<smem>>
      %59 = arith.index_cast %55 : i32 to index
      %c0_17 = arith.constant 0 : index
      %60 = vector.load %arg3[%59, %c0_17] : memref<10x32xf32, #tpu.memory_space<vmem>>, vector<1x32xf32>
      %61 = arith.index_cast %58 : i32 to index
      %c0_18 = arith.constant 0 : index
      %62 = vector.load %arg4[%61, %c0_18] : memref<12x32xf32, #tpu.memory_space<vmem>>, vector<1x32xf32>
      %63 = arith.mulf %60, %62 : vector<1x32xf32>
      %64 = arith.index_cast %52 : i32 to index
      %c0_19 = arith.constant 0 : index
      %65 = vector.load %arg7[%64, %c0_19] : memref<128x32xf32, #tpu.memory_space<vmem>>, vector<1x32xf32>
      tpu.vector_store %arg7[%64, %c0_19], %63 {strides = array<i32>} : memref<128x32xf32, #tpu.memory_space<vmem>>, vector<1x32xf32>,
      %c4_i32 = arith.constant 4 : i32
      %66 = arith.addi %9, %c4_i32 : i32
      %67 = arith.addi %0, %66 : i32
      %68 = arith.index_cast %67 : i32 to index
      %69 = memref.load %arg1[%68] : memref<128xi32, #tpu.memory_space<smem>>
      %70 = arith.addi %0, %66 : i32
      %71 = arith.index_cast %70 : i32 to index
      %72 = memref.load %arg2[%71] : memref<128xi32, #tpu.memory_space<smem>>
      %73 = arith.index_cast %69 : i32 to index
      %c0_20 = arith.constant 0 : index
      %74 = vector.load %arg3[%73, %c0_20] : memref<10x32xf32, #tpu.memory_space<vmem>>, vector<1x32xf32>
      %75 = arith.index_cast %72 : i32 to index
      %c0_21 = arith.constant 0 : index
      %76 = vector.load %arg4[%75, %c0_21] : memref<12x32xf32, #tpu.memory_space<vmem>>, vector<1x32xf32>
      %77 = arith.mulf %74, %76 : vector<1x32xf32>
      %78 = arith.index_cast %66 : i32 to index
      %c0_22 = arith.constant 0 : index
      %79 = vector.load %arg7[%78, %c0_22] : memref<128x32xf32, #tpu.memory_space<vmem>>, vector<1x32xf32>
      tpu.vector_store %arg7[%78, %c0_22], %77 {strides = array<i32>} : memref<128x32xf32, #tpu.memory_space<vmem>>, vector<1x32xf32>,
      %c5_i32 = arith.constant 5 : i32
      %80 = arith.addi %9, %c5_i32 : i32
      %81 = arith.addi %0, %80 : i32
      %82 = arith.index_cast %81 : i32 to index
      %83 = memref.load %arg1[%82] : memref<128xi32, #tpu.memory_space<smem>>
      %84 = arith.addi %0, %80 : i32
      %85 = arith.index_cast %84 : i32 to index
      %86 = memref.load %arg2[%85] : memref<128xi32, #tpu.memory_space<smem>>
      %87 = arith.index_cast %83 : i32 to index
      %c0_23 = arith.constant 0 : index
      %88 = vector.load %arg3[%87, %c0_23] : memref<10x32xf32, #tpu.memory_space<vmem>>, vector<1x32xf32>
      %89 = arith.index_cast %86 : i32 to index
      %c0_24 = arith.constant 0 : index
      %90 = vector.load %arg4[%89, %c0_24] : memref<12x32xf32, #tpu.memory_space<vmem>>, vector<1x32xf32>
      %91 = arith.mulf %88, %90 : vector<1x32xf32>
      %92 = arith.index_cast %80 : i32 to index
      %c0_25 = arith.constant 0 : index
      %93 = vector.load %arg7[%92, %c0_25] : memref<128x32xf32, #tpu.memory_space<vmem>>, vector<1x32xf32>
      tpu.vector_store %arg7[%92, %c0_25], %91 {strides = array<i32>} : memref<128x32xf32, #tpu.memory_space<vmem>>, vector<1x32xf32>,
      %c6_i32 = arith.constant 6 : i32
      %94 = arith.addi %9, %c6_i32 : i32
      %95 = arith.addi %0, %94 : i32
      %96 = arith.index_cast %95 : i32 to index
      %97 = memref.load %arg1[%96] : memref<128xi32, #tpu.memory_space<smem>>
      %98 = arith.addi %0, %94 : i32
      %99 = arith.index_cast %98 : i32 to index
      %100 = memref.load %arg2[%99] : memref<128xi32, #tpu.memory_space<smem>>
      %101 = arith.index_cast %97 : i32 to index
      %c0_26 = arith.constant 0 : index
      %102 = vector.load %arg3[%101, %c0_26] : memref<10x32xf32, #tpu.memory_space<vmem>>, vector<1x32xf32>
      %103 = arith.index_cast %100 : i32 to index
      %c0_27 = arith.constant 0 : index
      %104 = vector.load %arg4[%103, %c0_27] : memref<12x32xf32, #tpu.memory_space<vmem>>, vector<1x32xf32>
      %105 = arith.mulf %102, %104 : vector<1x32xf32>
      %106 = arith.index_cast %94 : i32 to index
      %c0_28 = arith.constant 0 : index
      %107 = vector.load %arg7[%106, %c0_28] : memref<128x32xf32, #tpu.memory_space<vmem>>, vector<1x32xf32>
      tpu.vector_store %arg7[%106, %c0_28], %105 {strides = array<i32>} : memref<128x32xf32, #tpu.memory_space<vmem>>, vector<1x32xf32>,
      %c7_i32 = arith.constant 7 : i32
      %108 = arith.addi %9, %c7_i32 : i32
      %109 = arith.addi %0, %108 : i32
      %110 = arith.index_cast %109 : i32 to index
      %111 = memref.load %arg1[%110] : memref<128xi32, #tpu.memory_space<smem>>
      %112 = arith.addi %0, %108 : i32
      %113 = arith.index_cast %112 : i32 to index
      %114 = memref.load %arg2[%113] : memref<128xi32, #tpu.memory_space<smem>>
      %115 = arith.index_cast %111 : i32 to index
      %c0_29 = arith.constant 0 : index
      %116 = vector.load %arg3[%115, %c0_29] : memref<10x32xf32, #tpu.memory_space<vmem>>, vector<1x32xf32>
      %117 = arith.index_cast %114 : i32 to index
      %c0_30 = arith.constant 0 : index
      %118 = vector.load %arg4[%117, %c0_30] : memref<12x32xf32, #tpu.memory_space<vmem>>, vector<1x32xf32>
      %119 = arith.mulf %116, %118 : vector<1x32xf32>
      %120 = arith.index_cast %108 : i32 to index
      %c0_31 = arith.constant 0 : index
      %121 = vector.load %arg7[%120, %c0_31] : memref<128x32xf32, #tpu.memory_space<vmem>>, vector<1x32xf32>
      tpu.vector_store %arg7[%120, %c0_31], %119 {strides = array<i32>} : memref<128x32xf32, #tpu.memory_space<vmem>>, vector<1x32xf32>,
    }
    %c16_i32_0 = arith.constant 16 : i32
    %c0 = arith.constant 0 : index
    %c0_1 = arith.constant 0 : index
    %2 = vector.load %arg7[%c0, %c0_1] : memref<128x32xf32, #tpu.memory_space<vmem>>, vector<128x32xf32>
    %cst = arith.constant dense<0.000000e+00> : vector<128xf32>
    %3 = vector.multi_reduction <add>, %2, %cst [1] : vector<128x32xf32> to vector<128xf32>
    %4 = vector.shape_cast %3 : vector<128xf32> to vector<1x128xf32>
    %c0_2 = arith.constant 0 : index
    %c0_3 = arith.constant 0 : index
    %5 = vector.load %arg5[%c0_2, %c0_3] : memref<1x128xf32, #tpu.memory_space<vmem>>, vector<1x128xf32>
    %6 = arith.addf %4, %5 : vector<1x128xf32>
    %c0_4 = arith.constant 0 : index
    %c0_5 = arith.constant 0 : index
    %7 = vector.load %arg6[%c0_4, %c0_5] : memref<1x128xf32, #tpu.memory_space<vmem>>, vector<1x128xf32>
    tpu.vector_store %arg6[%c0_4, %c0_5], %6 {strides = array<i32>} : memref<1x128xf32, #tpu.memory_space<vmem>>, vector<1x128xf32>,
    return
  }
  func.func @transform_0(%arg0: i32, %arg1: memref<128xi32, #tpu.memory_space<smem>>, %arg2: memref<128xi32, #tpu.memory_space<smem>>) -> (i32, i32) {
    %c0_i32 = arith.constant 0 : i32
    %c0_i32_0 = arith.constant 0 : i32
    %c0_i32_1 = arith.constant 0 : i32
    return %c0_i32, %c0_i32_0 : i32, i32
  }
  func.func @transform_1(%arg0: i32, %arg1: memref<128xi32, #tpu.memory_space<smem>>, %arg2: memref<128xi32, #tpu.memory_space<smem>>) -> (i32, i32) {
    %c0_i32 = arith.constant 0 : i32
    %c0_i32_0 = arith.constant 0 : i32
    %c0_i32_1 = arith.constant 0 : i32
    return %c0_i32, %c0_i32_0 : i32, i32
  }
  func.func @transform_2(%arg0: i32, %arg1: memref<128xi32, #tpu.memory_space<smem>>, %arg2: memref<128xi32, #tpu.memory_space<smem>>) -> (i32, i32) {
    %c0_i32 = arith.constant 0 : i32
    %c0_i32_0 = arith.constant 0 : i32
    return %arg0, %c0_i32 : i32, i32
  }
  func.func @transform_3(%arg0: i32, %arg1: memref<128xi32, #tpu.memory_space<smem>>, %arg2: memref<128xi32, #tpu.memory_space<smem>>) -> (i32, i32) {
    %c0_i32 = arith.constant 0 : i32
    %c0_i32_0 = arith.constant 0 : i32
    return %arg0, %c0_i32 : i32, i32
  }
}

</mosaic_0001>

<bundles_post_ra>
// kernel: tpu_custom_call.1
= control target key start
LH: loop header
LB: loop body
LE: loop exit
PB: predicated region body
PF: predicated region fallthrough
CT: control target
= control target key end

     0   :  { %s873_s0 = inlined_call_operand.hbm [shape: s32[128], index: 0, kind: input, shape index: {}]   ;;  %s874_s2 = inlined_call_operand.hbm [shape: f32[10,32], index: 2, kind: input, shape index: {}]   ;;  %s875_s3 = inlined_call_operand.hbm [shape: f32[12,32], index: 3, kind: input, shape index: {}]   ;;  %s876_s4 = inlined_call_operand.vmem [shape: f32[1,128], index: 4, kind: input, shape index: {}]   ;;  %s877_s5 = inlined_call_operand.hbm [shape: f32[1,128], index: 5, kind: output, shape index: {}]   ;;  %s878_s1 = inlined_call_operand.vmem [shape: s32[128], index: 1, kind: input, shape index: {}]  }
   0x1   :  { %s586_s20 = scalar_lea.hbm %s873_s0, 16 }
   0x2   :  { %p587_p0 = scmp.ne.s32.totalorder %s873_s0, %s586_s20  ;;  %p590_p1 = scmp.lt.u32.totalorder %s586_s20, %s873_s0 }
   0x4   :  { %p592_p2 = pnand %p590_p1, %p587_p0 }
   0x6   :  { %595 = shalt.err (!%p592_p2)  }
   0x7   :  { %s690_s25 = smov [#allocation4]   ;;  %s12_s30 = sshll.u32 %s878_s1, 4  ;;  %s13_s30 = int_to_ptr.vmem [resolvable:$true] %s12_s30 }
   0x8   :  { %11 = dma.hbm_to_smem %s873_s0, 16, %s690_s25, [#allocation3] }
   0x9   :  { %s596_s6 = scalar_lea.vmem %s13_s30, 16  ;;  %p601_p4 = scmp.lt.s32.totalorder %s13_s30, %s13_s30 }
   0xa   :  { %p597_p3 = scmp.ne.s32.totalorder %s13_s30, %s596_s6  ;;  %p602_p5 = scmp.lt.s32.totalorder %s596_s6, %s596_s6 }
   0xc   :  { %p603_p6 = por %p602_p5, %p601_p4 }
   0xe   :  { %p604_p7 = pnand %p603_p6, %p597_p3 }
  0x10   :  { %607 = shalt.err (!%p604_p7)  }
  0x11   :  { %s691_s7 = smov [#allocation5]  }
  0x12   :  { %15 = dma.vmem_to_smem %s13_s30, 16, %s691_s7, [#allocation3] }
  0x13   :  { %678 = dma.done.wait [#allocation3], 32 }
  0x14   :  { %679 = vsyncadd [#allocation3], 4294967264 }
  0x15   :  { %17 = sfence }
  0x16   :  { %18 = vsyncpa [#allocation7], 0 }
  0x17   :  { %19 = vsyncpa [#allocation10], 0 }
  0x18   :  { %20 = vsyncpa [#allocation8], 0  ;;  %s692_s0 = smov [#allocation6]   ;;  %s608_s10 = scalar_lea.hbm %s874_s2, 256 }
  0x19   :  { %s26_s8 = sshll.u32 %s692_s0, 4  ;;  %p609_p8 = scmp.ne.s32.totalorder %s874_s2, %s608_s10  ;;  %s27_s8 = int_to_ptr.vmem [resolvable:$true] %s26_s8 }
  0x1a   :  { %p612_p9 = scmp.lt.u32.totalorder %s608_s10, %s874_s2 }
  0x1c   :  { %p614_p10 = pnand %p612_p9, %p609_p8 }
  0x1e   :  { %617 = shalt.err (!%p614_p10)
}
  0x1f   :  { %s618_s15 = scalar_lea.vmem %s27_s8, 256  ;;  %p623_p12 = scmp.lt.s32.totalorder %s27_s8, %s27_s8 }
  0x20   :  { %p619_p11 = scmp.ne.s32.totalorder %s27_s8, %s618_s15  ;;  %p624_p13 = scmp.lt.s32.totalorder %s618_s15, %s618_s15 }
  0x22   :  { %p625_p0 = por %p624_p13, %p623_p12 }
  0x24   :  { %p626_p1 = pnand %p625_p0, %p619_p11 }
  0x26   :  { %629 = shalt.err (!%p626_p1)
}
  0x27   :  { %s693_s16 = smov 128   ;;  %s694_s17 = smov 8  }
  0x28   :  { %32 = dma.hbm_to_vmem [thread:$0]  %s874_s2, 256, %s27_s8, [#allocation7], %s693_s16, %s693_s16, %s694_s17  }
  0x29   :  { %s695_s20 = smov [#allocation9]   ;;  %s630_s24 = scalar_lea.hbm %s875_s3, 256 }
  0x2a   :  { %s38_s21 = sshll.u32 %s695_s20, 4  ;;  %p631_p2 = scmp.ne.s32.totalorder %s875_s3, %s630_s24  ;;  %s39_s21 = int_to_ptr.vmem [resolvable:$true] %s38_s21 }
  0x2b   :  { %p634_p3 = scmp.lt.u32.totalorder %s630_s24, %s875_s3 }
  0x2d   :  { %p636_p4 = pnand %p634_p3, %p631_p2 }
  0x2f   :  { %639 = shalt.err (!%p636_p4)
}
  0x30   :  { %s640_s29 = scalar_lea.vmem %s39_s21, 256  ;;  %p645_p6 = scmp.lt.s32.totalorder %s39_s21, %s39_s21 }
  0x31   :  { %p641_p5 = scmp.ne.s32.totalorder %s39_s21, %s640_s29  ;;  %p646_p7 = scmp.lt.s32.totalorder %s640_s29, %s640_s29 }
  0x33   :  { %p647_p8 = por %p646_p7, %p645_p6 }
  0x35   :  { %p648_p9 = pnand %p647_p8, %p641_p5 }
  0x37   :  { %651 = shalt.err (!%p648_p9)
}
  0x38   :  { %44 = dma.hbm_to_vmem [thread:$0]  %s875_s3, 256, %s39_s21, [#allocation10], %s693_s16, %s693_s16, %s694_s17  }
  0x39   :  { %680 = dma.done.wait [#allocation7], 256  }
  0x3a   :  { %681 = vsyncadd [#allocation7], 4294967040 }
  0x3b   :  { %682 = dma.done.wait [#allocation10], 256  }
  0x3c   :  { %683 = vsyncadd [#allocation10], 4294967040  ;;  %s767_s6 = smov 0  }
  0x3d LB: > { %s773_s7 = sshll.u32 %s688_s6, 3  ;;  %vm70_vm0 = vcmask 253952   ;;  %s59_s6 = sadd.s32 1, %s688_s6   ;;  %s688_s6 = sphi %s767_s6, %s59_s6  }
  0x3e   : > { %s62_s3 = sld [smem:[#allocation4 + %s773_s7]]  ;;  %s72_s8 = sadd.s32 1, %s773_s7 }
  0x3f   : > { %s63_s0 = sld [smem:[#allocation5 + %s773_s7]]  ;;  %s83_s10 = sadd.s32 2, %s773_s7 }
  0x40   : > { %s74_s1 = sld [smem:[#allocation4 + %s72_s8]]  ;;  %s94_s11 = sadd.s32 3, %s773_s7 }
  0x41   : > { %s75_s9 = sld [smem:[#allocation5 + %s72_s8]]  ;;  %s105_s18 = sadd.s32 4, %s773_s7 }
  0x42   : > { %s85_s12 = sld [smem:[#allocation4 + %s83_s10]]  ;;  %s116_s19 = sadd.s32 5, %s773_s7 }
  0x43   : > { %s86_s13 = sld [smem:[#allocation5 + %s83_s10]]  ;;  %s783_s24 = scalar_lea.vmem [#allocation2], %s773_s7 }
  0x44   : > { %s96_s14 = sld [smem:[#allocation4 + %s94_s11]]  ;;  %s64_s16 = scalar_lea.vmem [#allocation6], %s62_s3 }
  0x45   : > { %s97_s15 = sld [smem:[#allocation5 + %s94_s11]]  ;;  %v65_v0 = vld [vmem:[%s64_s16] sm:$0x1]  ;;  %s66_s17 = scalar_lea.vmem [#allocation9], %s63_s0 }
  0x46   : > { %v67_v1 = vld [vmem:[%s66_s17] sm:$0x1]  ;;  %s76_s20 = scalar_lea.vmem [#allocation6], %s74_s1  ;;  %s107_s22 = sld [smem:[#allocation4 + %s105_s18]] }
  0x47   : > { %v68_v2 = vmul.f32 %v67_v1, %v65_v0  ;;  %v77_v3 = vld [vmem:[%s76_s20] sm:$0x1]  ;;  %s78_s21 = scalar_lea.vmem [#allocation9], %s75_s9  ;;  %s108_s23 = sld [smem:[#allocation5 + %s105_s18]] }
  0x48   : > { %v79_v4 = vld [vmem:[%s78_s21] sm:$0x1]  ;;  %s87_s25 = scalar_lea.vmem [#allocation6], %s85_s12  ;;  %s118_s29 = sld [smem:[#allocation4 + %s116_s19]] }
  0x49   : > { %71 = vst.msk [vmem:[%s783_s24] sm:$0x1] %vm70_vm0, %v68_v2  ;;  %v80_v5 = vmul.f32 %v79_v4, %v77_v3  ;;  %v88_v6 = vld [vmem:[%s87_s25] sm:$0x1]  ;;  %s89_s26 = scalar_lea.vmem [#allocation9], %s86_s13  ;;  %s119_s2 = sld [smem:[#allocation5 + %s116_s19]] }
  0x4a   : > { %v90_v7 = vld [vmem:[%s89_s26] sm:$0x1]  ;;  %s98_s27 = scalar_lea.vmem [#allocation6], %s96_s14  ;;  %s127_s30 = sadd.s32 6, %s773_s7 }
  0x4b   : > { %554 = vst.msk [vmem:[%s783_s24 + $0x1] sm:$0x1] %vm70_vm0, %v80_v5  ;;  %v91_v8 = vmul.f32 %v90_v7, %v88_v6  ;;  %v99_v9 = vld [vmem:[%s98_s27] sm:$0x1]  ;;  %s100_s28 = scalar_lea.vmem [#allocation9], %s97_s15  ;;  %s138_s3 = sadd.s32 7, %s773_s7 }
  0x4c   : > { %v101_v10 = vld [vmem:[%s100_s28] sm:$0x1]  ;;  %s129_s0 = sld [smem:[#allocation4 + %s127_s30]]  ;;  %s109_s1 = scalar_lea.vmem [#allocation6], %s107_s22 }
  0x4d   : > { %v102_v11 = vmul.f32 %v101_v10, %v99_v9  ;;  %556 = vst.msk [vmem:[%s783_s24 + $0x2] sm:$0x1] %vm70_vm0, %v91_v8  ;;  %s130_s8 = sld [smem:[#allocation5 + %s127_s30]]  ;;  %v110_v12 = vld [vmem:[%s109_s1] sm:$0x1]  ;;  %s111_s9 = scalar_lea.vmem [#allocation9], %s108_s23 }
  0x4e   : > { %v112_v13 = vld [vmem:[%s111_s9] sm:$0x1]  ;;  %s140_s10 = sld [smem:[#allocation4 + %s138_s3]]  ;;  %s120_s12 = scalar_lea.vmem [#allocation6], %s118_s29 }
  0x4f   : > { %558 = vst.msk [vmem:[%s783_s24 + $0x3] sm:$0x1] %vm70_vm0, %v102_v11  ;;  %s141_s11 = sld [smem:[#allocation5 + %s138_s3]]  ;;  %v113_v14 = vmul.f32 %v112_v13, %v110_v12  ;;  %v121_v15 = vld [vmem:[%s120_s12] sm:$0x1]  ;;  %s122_s7 = scalar_lea.vmem [#allocation9], %s119_s2 }
  0x50   : > { %v123_v16 = vld [vmem:[%s122_s7] sm:$0x1]  ;;  %p56_p10 = scmp.ge.s32.totalorder %s59_s6, 16  }
  0x51   : > { %560 = vst.msk [vmem:[%s783_s24 + $0x4] sm:$0x1] %vm70_vm0, %v113_v14  ;;  %v124_v17 = vmul.f32 %v123_v16, %v121_v15  ;;  %vm165_vm1 = vcmask (%p56_p10), 261120   ;;  %v567_v56 = vld [vmem:[%s876_s4] ss:$0 sm:$0xff] (%p56_p10)  ;;  %v696_v57 = vmov (%p56_p10), 0  }
  0x52   : > { %s131_s13 = scalar_lea.vmem [#allocation6], %s129_s0  ;;  %585 = vset.pattern.permute.xlu1 (%p56_p10), %v696_v57  ;;  %584 = vset.pattern.permute.xlu0 (%p56_p10), %v696_v57  ;;  %vm390_vm2 = vcmask (%p56_p10), 130112   ;;  %vm397_vm3 = vcmask (%p56_p10), 195712   ;;  %vm404_vm4 = vcmask (%p56_p10), 261312   ;;  %vm411_vm5 = vcmask (%p56_p10), 326912   ;;  %s697_s4 = smov (%p56_p10), [#allocation11]  }
  0x53   : > { %v132_v18 = vld [vmem:[%s131_s13] sm:$0x1]  ;;  %s133_s14 = scalar_lea.vmem [#allocation9], %s130_s8  ;;  %562 = vst.msk [vmem:[%s783_s24 + $0x5] sm:$0x1] %vm70_vm0, %v124_v17  ;;  %58 = sbr.rel (!%p56_p10) target bundleno = 61 (0x3d), region = 71 }
  0x54   : > { %v134_v19 = vld [vmem:[%s133_s14] sm:$0x1]  ;;  %s142_s15 = scalar_lea.vmem [#allocation6], %s140_s10  ;;  %vm418_vm6 = vcmask (%p56_p10), 392512   ;;  %vm425_vm7 = vcmask (%p56_p10), 458112   ;;  %vm432_vm8 = vcmask (%p56_p10), 523712  }
  0x55   : > { %v135_v20 = vmul.f32 %v134_v19, %v132_v18  ;;  %v143_v21 = vld [vmem:[%s142_s15] sm:$0x1]  ;;  %s144_s16 = scalar_lea.vmem [#allocation9], %s141_s11  ;;  %vm439_vm9 = vcmask (%p56_p10), 589312   ;;  %vm446_vm10 = vcmask (%p56_p10), 654912   ;;  %vm453_vm11 = vcmask (%p56_p10), 720512  }
  0x56   : > { %v145_v22 = vld [vmem:[%s144_s16] sm:$0x1]  ;;  %vm460_vm12 = vcmask (%p56_p10), 786112   ;;  %vm467_vm13 = vcmask (%p56_p10), 851712   ;;  %vm474_vm14 = vcmask (%p56_p10), 917312   ;;  %vm481_vm15 = vcmask (%p56_p10), 982912  }
  0x57   : > { %564 = vst.msk [vmem:[%s783_s24 + $0x6] sm:$0x1] %vm70_vm0, %v135_v20  ;;  %v146_v23 = vmul.f32 %v145_v22, %v143_v21  ;;  %s498_s18 = sshll.u32 (%p56_p10), %s697_s4, 4  ;;  %s499_s18 = int_to_ptr.vmem [resolvable:$true] %s498_s18 }
  0x58   :  { %s652_s19 = scalar_lea.vmem (%p56_p10), %s499_s18, 16  ;;  %s656_s20 = scalar_lea.vmem (%p56_p10), %s499_s18, 32 }
  0x59   : > { %566 = vst.msk [vmem:[%s783_s24 + $0x7] sm:$0x1] %vm70_vm0, %v146_v23  ;;  %vm488_vm0 = vcmask (%p56_p10), 1048512   ;;  %p653_p11 = scmp.ne.s32.totalorder (%p56_p10), %s499_s18, %s652_s19  ;;  %p657_p12 = scmp.lt.s32.totalorder (%p56_p10), %s499_s18, %s499_s18 }
  0x5a   :  { %p658_p13 = scmp.lt.s32.totalorder %s656_s20, %s652_s19 }
  0x5c   :  { %p659_p0 = por %p658_p13, %p657_p12 }
  0x5e   :  { %p660_p1 = pnand %p659_p0, %p653_p11 }
  0x60   :  { %v151_v24 = vld [vmem:[#allocation2 + $0x10] sm:$0xff]  ;;  %v149_v25 = vld [vmem:[#allocation2] sm:$0xff]  ;;  %v152_v26 = vld [vmem:[#allocation2 + $0x18] sm:$0xff] }
  0x61   :  { %v172_v27 = vsel %vm165_vm1, %v151_v24, 0.0  ;;  %v166_v28 = vsel %vm165_vm1, %v149_v25, 0.0  ;;  %v150_v29 = vld [vmem:[#allocation2 + $0x8] sm:$0xff]  ;;  %v175_v30 = vsel %vm165_vm1, %v152_v26, 0.0  ;;  %v153_v33 = vld [vmem:[#allocation2 + $0x20] sm:$0xff]  ;;  %v156_v36 = vld [vmem:[#allocation2 + $0x38] sm:$0xff] }
  0x62   :  { %173 = vadd.xlane.f32.xlu1 %v172_v27  ;;  %167 = vadd.xlane.f32.xlu0 %v166_v28  ;;  %v169_v31 = vsel %vm165_vm1, %v150_v29, 0.0  ;;  %v154_v32 = vld [vmem:[#allocation2 + $0x28] sm:$0xff]  ;;  %v178_v35 = vsel %vm165_vm1, %v153_v33, 0.0  ;;  %v155_v37 = vld [vmem:[#allocation2 + $0x30] sm:$0xff]  ;;  %v187_v38 = vsel %vm165_vm1, %v156_v36, 0.0  ;;  %v157_v41 = vld [vmem:[#allocation2 + $0x40] sm:$0xff] }
  0x63   :  { %v181_v34 = vsel %vm165_vm1, %v154_v32, 0.0  ;;  %v184_v39 = vsel %vm165_vm1, %v155_v37, 0.0  ;;  %v158_v40 = vld [vmem:[#allocation2 + $0x48] sm:$0xff]  ;;  %v190_v43 = vsel %vm165_vm1, %v157_v41, 0.0  ;;  %v160_v44 = vld [vmem:[#allocation2 + $0x58] sm:$0xff]  ;;  %v159_v45 = vld [vmem:[#allocation2 + $0x50] sm:$0xff] }
  0x64   :  { %v193_v42 = vsel %vm165_vm1, %v158_v40, 0.0  ;;  %v199_v46 = vsel %vm165_vm1, %v160_v44, 0.0  ;;  %v196_v47 = vsel %vm165_vm1, %v159_v45, 0.0  ;;  %v162_v48 = vld [vmem:[#allocation2 + $0x68] sm:$0xff]  ;;  %v161_v49 = vld [vmem:[#allocation2 + $0x60] sm:$0xff]  ;;  %v164_v52 = vld [vmem:[#allocation2 + $0x78] sm:$0xff] }
  0x65   :  { %v205_v50 = vsel %vm165_vm1, %v162_v48, 0.0  ;;  %v202_v51 = vsel %vm165_vm1, %v161_v49, 0.0  ;;  %v163_v53 = vld [vmem:[#allocation2 + $0x70] sm:$0xff]  ;;  %v211_v54 = vsel %vm165_vm1, %v164_v52, 0.0 }
  0x66   :  { %176 = vadd.xlane.f32.xlu1 %v175_v30  ;;  %170 = vadd.xlane.f32.xlu0 %v169_v31  ;;  %v208_v55 = vsel %vm165_vm1, %v163_v53, 0.0 }
  0x6a   :  { %182 = vadd.xlane.f32.xlu1 %v181_v34  ;;  %179 = vadd.xlane.f32.xlu0 %v178_v35 }
  0x6e   :  { %188 = vadd.xlane.f32.xlu1 %v187_v38  ;;  %185 = vadd.xlane.f32.xlu0 %v184_v39 }
  0x72   :  { %194 = vadd.xlane.f32.xlu1 %v193_v42  ;;  %191 = vadd.xlane.f32.xlu0 %v190_v43  ;;  %v379_v42 = vlaneseq }
  0x74   :  { %v825_v43 = vand.u32 127, %v379_v42  ;;  %v827_v44 = vshrl.u32 %v379_v42, 7 }
  0x76   :  { %200 = vadd.xlane.f32.xlu1 %v199_v46  ;;  %197 = vadd.xlane.f32.xlu0 %v196_v47  ;;  %v385_v45 = vadd.s32 4294967288, %v825_v43  ;;  %v392_v46 = vadd.s32 4294967280, %v825_v43  ;;  %v383_v49 = vsub.s32 %v825_v43, %v827_v44  ;;  %v406_v53 = vadd.s32 4294967264, %v825_v43 }
  0x78   :  { %v388_v48 = vsub.s32 %v385_v45, %v827_v44  ;;  %v395_v52 = vsub.s32 %v392_v46, %v827_v44  ;;  %v483_v45 = vadd.s32 4294967176, %v825_v43 }
  0x7a   :  { %206 = vadd.xlane.f32.xlu1 %v205_v50  ;;  %203 = vadd.xlane.f32.xlu0 %v202_v51  ;;  %v399_v50 = vadd.s32 4294967272, %v825_v43 }
  0x7c   :  { %v402_v57 = vsub.s32 %v399_v50, %v827_v44 }
  0x7e   :  { %212 = vadd.xlane.f32.xlu1 %v211_v54  ;;  %209 = vadd.xlane.f32.xlu0 %v208_v55 }
  0x8f   :  { %225 = vbcast.lane.b32.xlu1 %v567_v56, 264 }
  0x93   :  { %229 = vbcast.lane.b32.xlu1 %v567_v56, 272 }
  0x94   :  { %221 = vbcast.lane.b32.xlu0 %v567_v56, 256 }
  0x97   :  { %233 = vbcast.lane.b32.xlu1 %v567_v56, 280 }
  0x98   :  { %237 = vbcast.lane.b32.xlu0 %v567_v56, 288 }
  0x9b   :  { %241 = vbcast.lane.b32.xlu1 %v567_v56, 296 }
  0x9c   :  { %245 = vbcast.lane.b32.xlu0 %v567_v56, 304 }
  0x9f   :  { %249 = vbcast.lane.b32.xlu1 %v567_v56, 312 }
  0xa0   :  { %253 = vbcast.lane.b32.xlu0 %v567_v56, 320 }
  0xa3   :  { %257 = vbcast.lane.b32.xlu1 %v567_v56, 328 }
  0xa4   :  { %261 = vbcast.lane.b32.xlu0 %v567_v56, 336 }
  0xa7   :  { %265 = vbcast.lane.b32.xlu1 %v567_v56, 344 }
  0xa8   :  { %269 = vbcast.lane.b32.xlu0 %v567_v56, 352 }
  0xab   :  { %273 = vbcast.lane.b32.xlu1 %v567_v56, 360 }
  0xac   :  { %277 = vbcast.lane.b32.xlu0 %v567_v56, 368 }
  0xaf   :  { %281 = vbcast.lane.b32.xlu1 %v567_v56, 376 }
  0xef   :  { %v174_v58 = vpop.xlane.xlu1 %173  ;;  %v168_v59 = vpop.xlane.xlu0 %167 }
  0xf3   :  { %v177_v60 = vpop.xlane.xlu1 %176  ;;  %v171_v61 = vpop.xlane.xlu0 %170 }
  0xf7   :  { %v183_v62 = vpop.xlane.xlu1 %182  ;;  %v180_v63 = vpop.xlane.xlu0 %179 }
  0xfb   :  { %v189_v0 = vpop.xlane.xlu1 %188  ;;  %v186_v1 = vpop.xlane.xlu0 %185 }
  0xff   :  { %v195_v2 = vpop.xlane.xlu1 %194  ;;  %v192_v3 = vpop.xlane.xlu0 %191 }
 0x103   :  { %v201_v4 = vpop.xlane.xlu1 %200  ;;  %v198_v5 = vpop.xlane.xlu0 %197 }
 0x107   :  { %v207_v6 = vpop.xlane.xlu1 %206  ;;  %v204_v7 = vpop.xlane.xlu0 %203 }
 0x10b   :  { %v213_v8 = vpop.xlane.xlu1 %212  ;;  %v210_v9 = vpop.xlane.xlu0 %209 }
 0x10f   :  { %v226_v10 = vpop.permute.xlu1 %225  ;;  %v222_v11 = vpop.permute.xlu0 %221 }
 0x110   :  { %v300_v12 = vadd.f32 %v226_v10, %v171_v61  ;;  %v299_v13 = vadd.f32 %v222_v11, %v168_v59  ;;  %v420_v61 = vadd.s32 4294967248, %v825_v43 }
 0x112   :  { %335 = vperm.xlu1 %585, %v300_v12   ;;  %332 = vperm.xlu0 %584, %v299_v13   ;;  %v441_v13 = vadd.s32 4294967224, %v825_v43 }
 0x113   :  { %v230_v14 = vpop.permute.xlu1 %229  ;;  %v238_v15 = vpop.permute.xlu0 %237 }
 0x114   :  { %v301_v16 = vadd.f32 %v230_v14, %v174_v58  ;;  %v303_v19 = vadd.f32 %v238_v15, %v180_v63  ;;  %v413_v58 = vadd.s32 4294967256, %v825_v43 }
 0x116   :  { %338 = vperm.xlu1 %585, %v301_v16  }
 0x117   :  { %v234_v17 = vpop.permute.xlu1 %233  ;;  %v246_v18 = vpop.permute.xlu0 %245 }
 0x118   :  { %v302_v20 = vadd.f32 %v234_v17, %v177_v60  ;;  %v305_v23 = vadd.f32 %v246_v18, %v186_v1  ;;  %v409_v60 = vsub.s32 %v406_v53, %v827_v44  ;;  %v448_v17 = vadd.s32 4294967216, %v825_v43 }
 0x119   :  { %v486_v53 = vsub.s32 %v483_v45, %v827_v44 }
 0x11a   :  { %341 = vperm.xlu0 %584, %v302_v20   ;;  %344 = vperm.xlu1 %585, %v303_v19  }
 0x11b   :  { %v242_v21 = vpop.permute.xlu1 %241  ;;  %v254_v22 = vpop.permute.xlu0 %253 }
 0x11c   :  { %v304_v24 = vadd.f32 %v242_v21, %v183_v62  ;;  %v307_v27 = vadd.f32 %v254_v22, %v192_v3  ;;  %v427_v3 = vadd.s32 4294967240, %v825_v43  ;;  %v444_v22 = vsub.s32 %v441_v13, %v827_v44 }
 0x11e   :  { %347 = vperm.xlu0 %584, %v304_v24   ;;  %350 = vperm.xlu1 %585, %v305_v23   ;;  %v430_v12 = vsub.s32 %v427_v3, %v827_v44  ;;  %v455_v23 = vadd.s32 4294967208, %v825_v43 }
 0x11f   :  { %v250_v25 = vpop.permute.xlu1 %249  ;;  %v262_v26 = vpop.permute.xlu0 %261 }
 0x120   :  { %v306_v28 = vadd.f32 %v250_v25, %v189_v0  ;;  %v309_v31 = vadd.f32 %v262_v26, %v198_v5  ;;  %v451_v26 = vsub.s32 %v448_v17, %v827_v44 }
 0x122   :  { %353 = vperm.xlu0 %584, %v306_v28   ;;  %356 = vperm.xlu1 %585, %v307_v27   ;;  %v462_v27 = vadd.s32 4294967200, %v825_v43 }
 0x123   :  { %v258_v29 = vpop.permute.xlu1 %257  ;;  %v270_v30 = vpop.permute.xlu0 %269 }
 0x124   :  { %v308_v32 = vadd.f32 %v258_v29, %v195_v2  ;;  %v311_v34 = vadd.f32 %v270_v30, %v204_v7  ;;  %v416_v2 = vsub.s32 %v413_v58, %v827_v44  ;;  %v434_v7 = vadd.s32 4294967232, %v825_v43 }
 0x126   :  { %359 = vperm.xlu0 %584, %v308_v32   ;;  %362 = vperm.xlu1 %585, %v309_v31   ;;  %v437_v16 = vsub.s32 %v434_v7, %v827_v44  ;;  %v458_v32 = vsub.s32 %v455_v23, %v827_v44 }
 0x127   :  { %v266_v33 = vpop.permute.xlu1 %265  ;;  %v278_v36 = vpop.permute.xlu0 %277 }
 0x128   :  { %v310_v35 = vadd.f32 %v266_v33, %v201_v4  ;;  %v313_v38 = vadd.f32 %v278_v36, %v210_v9  ;;  %v469_v33 = vadd.s32 4294967192, %v825_v43  ;;  %v465_v36 = vsub.s32 %v462_v27, %v827_v44 }
 0x12a   :  { %365 = vperm.xlu0 %584, %v310_v35   ;;  %368 = vperm.xlu1 %585, %v311_v34   ;;  %v472_v42 = vsub.s32 %v469_v33, %v827_v44 }
 0x12b   :  { %v274_v37 = vpop.permute.xlu1 %273 }
 0x12c   :  { %v312_v39 = vadd.f32 %v274_v37, %v207_v6  ;;  %v423_v6 = vsub.s32 %v420_v61, %v827_v44  ;;  %v476_v37 = vadd.s32 4294967184, %v825_v43 }
 0x12e   :  { %371 = vperm.xlu0 %584, %v312_v39   ;;  %374 = vperm.xlu1 %585, %v313_v38  }
 0x12f   :  { %v282_v40 = vpop.permute.xlu1 %281 }
 0x130   :  { %v314_v41 = vadd.f32 %v282_v40, %v213_v8 }
 0x132   :  { %377 = vperm.xlu0 %584, %v314_v41  }
 0x191   :  { %v336_v47 = vpop.permute.xlu1 %335  ;;  %v333_v51 = vpop.permute.xlu0 %332 }
 0x192   :  { %v389_v55 = vrot.slane %v336_v47, %v388_v48  ;;  %v384_v56 = vrot.slane %v333_v51, %v383_v49  ;;  %v479_v48 = vsub.s32 %v476_v37, %v827_v44 }
 0x194   :  { %v391_v0 = vsel %vm390_vm2, %v389_v55, %v384_v56 }
 0x195   :  { %v339_v54 = vpop.permute.xlu1 %338 }
 0x196   :  { %v396_v59 = vrot.slane %v339_v54, %v395_v52 }
 0x198   :  { %v398_v4 = vsel %vm397_vm3, %v396_v59, %v391_v0 }
 0x199   :  { %v345_v62 = vpop.permute.xlu1 %344  ;;  %v342_v63 = vpop.permute.xlu0 %341 }
 0x19a   :  { %v403_v1 = vrot.slane %v342_v63, %v402_v57  ;;  %v410_v5 = vrot.slane %v345_v62, %v409_v60 }
 0x19c   :  { %v405_v8 = vsel %vm404_vm4, %v403_v1, %v398_v4 }
 0x19d   :  { %v351_v9 = vpop.permute.xlu1 %350  ;;  %v348_v10 = vpop.permute.xlu0 %347  ;;  %v412_v15 = vsel %vm411_vm5, %v410_v5, %v405_v8 }
 0x19e   :  { %v417_v11 = vrot.slane %v348_v10, %v416_v2  ;;  %v424_v14 = vrot.slane %v351_v9, %v423_v6 }
 0x1a0   :  { %v419_v18 = vsel %vm418_vm6, %v417_v11, %v412_v15 }
 0x1a1   :  { %v357_v19 = vpop.permute.xlu1 %356  ;;  %v354_v20 = vpop.permute.xlu0 %353  ;;  %v426_v25 = vsel %vm425_vm7, %v424_v14, %v419_v18 }
 0x1a2   :  { %v431_v21 = vrot.slane %v354_v20, %v430_v12  ;;  %v438_v24 = vrot.slane %v357_v19, %v437_v16 }
 0x1a4   :  { %v433_v28 = vsel %vm432_vm8, %v431_v21, %v426_v25 }
 0x1a5   :  { %v363_v29 = vpop.permute.xlu1 %362  ;;  %v360_v30 = vpop.permute.xlu0 %359  ;;  %v440_v35 = vsel %vm439_vm9, %v438_v24, %v433_v28 }
 0x1a6   :  { %v445_v31 = vrot.slane %v360_v30, %v444_v22  ;;  %v452_v34 = vrot.slane %v363_v29, %v451_v26 }
 0x1a8   :  { %v447_v38 = vsel %vm446_vm10, %v445_v31, %v440_v35 }
 0x1a9   :  { %v369_v39 = vpop.permute.xlu1 %368  ;;  %v366_v40 = vpop.permute.xlu0 %365  ;;  %v454_v47 = vsel %vm453_vm11, %v452_v34, %v447_v38 }
 0x1aa   :  { %v459_v41 = vrot.slane %v366_v40, %v458_v32  ;;  %v466_v46 = vrot.slane %v369_v39, %v465_v36 }
 0x1ac   :  { %v461_v49 = vsel %vm460_vm12, %v459_v41, %v454_v47 }
 0x1ad   :  { %v375_v50 = vpop.permute.xlu1 %374  ;;  %v372_v51 = vpop.permute.xlu0 %371  ;;  %v468_v55 = vsel %vm467_vm13, %v466_v46, %v461_v49 }
 0x1ae   :  { %v473_v52 = vrot.slane %v372_v51, %v472_v42  ;;  %v480_v54 = vrot.slane %v375_v50, %v479_v48 }
 0x1b0   :  { %v475_v56 = vsel %vm474_vm14, %v473_v52, %v468_v55 }
 0x1b1   :  { %v378_v57 = vpop.permute.xlu0 %377  ;;  %v482_v58 = vsel %vm481_vm15, %v480_v54, %v475_v56 }
 0x1b2   :  { %v487_v43 = vrot.slane %v378_v57, %v486_v53 }
 0x1b4   :  { %v489_v59 = vsel %vm488_vm0, %v487_v43, %v482_v58 }
 0x1b5   :  { %491 = vst [vmem:[#allocation11] sm:$0x1] %v489_v59 }
 0x1b6   :  { %663 = shalt.err (!%p660_p1)
}
 0x1b7   :  { %s664_s23 = scalar_lea.hbm %s877_s5, 16 }
 0x1b8   :  { %p665_p2 = scmp.ne.s32.totalorder %s877_s5, %s664_s23  ;;  %p668_p3 = scmp.lt.u32.totalorder %s664_s23, %s877_s5 }
 0x1ba   :  { %p670_p4 = pnand %p668_p3, %p665_p2 }
 0x1bc   :  { %673 = shalt.err (!%p670_p4)
}
 0x1bd   :  { %501 = dma.vmem_to_hbm [thread:$0]  %s499_s18, 16, %s877_s5, [#allocation8]  }
 0x1be   :  { %684 = dma.done.wait [#allocation8], 16  }
 0x1bf   :  { %685 = vsyncadd [#allocation8], 4294967280 }
 0x1c0   :  { %505 = vsyncpa [#allocation7], 1 }
 0x1c1   :  { %506 = vsyncpa [#allocation10], 1 }
 0x1c2   :  { %507 = vsyncpa [#allocation8], 1 }

</bundles_post_ra>
